<compile_context>
chip_gen: v7x
topology: tpu7x:2x2x1
jax: 0.10.0
libtpu: 0.0.40
codegen_flags: <defaults>
</compile_context>

<pallas_src>
import functools

import jax
import jax.numpy as jnp
from jax.experimental import pallas as pl
from jax.experimental.pallas import tpu as pltpu


def _round_up(n: int, m: int) -> int:
    return (n + m - 1) // m * m


def _residual_kernel(x_ref, w1_ref, b1_ref, w2_ref, b2_ref, o_ref, acc_ref):
    # x_ref : (tm, D)   row tile of the flattened (M, D) input
    # w1_ref: (D, tn)   column block of W1       b1_ref: (1, tn)
    # w2_ref: (tn, D)   row block of W2          b2_ref: (1, D)
    # o_ref : (tm, D)   output row tile          acc_ref: (tm, D) f32 scratch
    #
    # grid = (M tiles, weight blocks); the weight-block axis is a reduction:
    #   acc += ReLU(x @ W1[:, j] + b1[j]) @ W2[j, :]
    # and the bias/residual/outer-ReLU epilogue runs on the last j.
    j = pl.program_id(1)

    @pl.when(j == 0)
    def _():
        acc_ref[...] = jnp.zeros_like(acc_ref)

    mm_dtype = w1_ref.dtype            # bf16 weights -> bf16 MXU path (all gens)
    x = x_ref[...]

    h = jnp.dot(x.astype(mm_dtype), w1_ref[...],
                preferred_element_type=jnp.float32)
    h = jnp.maximum(h + b1_ref[...].astype(jnp.float32), 0.0)   # inner fn (ReLU)
    acc_ref[...] += jnp.dot(h.astype(mm_dtype), w2_ref[...],
                            preferred_element_type=jnp.float32)

    @pl.when(j == pl.num_programs(1) - 1)
    def _():
        p = acc_ref[...] + b2_ref[...].astype(jnp.float32)
        # residual add + outer fn (ReLU), all in f32 (v5e VPU has no bf16).
        o_ref[...] = jnp.maximum(x.astype(jnp.float32) + p, 0.0).astype(o_ref.dtype)


def _vmem_capacity_bytes() -> int:
    try:
        return int(pltpu.get_tpu_info().vmem_capacity_bytes)
    except Exception:
        return 64 << 20     # conservative fallback (v7x per-TC VMEM)


def _pick_row_tile(M: int, D: int, x_itemsize: int, act_budget: int) -> int:
    """Row tile: large for small D (grid-overhead bound), bounded by VMEM & M."""
    if D <= 256:
        tgt = 2048
    elif D <= 512:
        tgt = 1024
    elif D <= 1024:
        tgt = 512
    else:
        tgt = 256
    # x (2 bufs) + out (2 bufs) in the I/O dtype; acc + h + temps in f32.
    bytes_per_row = (4 * x_itemsize + 12) * D
    tgt = min(tgt, max(8, act_budget // bytes_per_row))
    # Keep >= 2 steps along M so v7x megacore has work for both TensorCores.
    if M > 8:
        tgt = min(tgt, _round_up(pl.cdiv(M, 2), 8))
    if tgt >= M:
        return M                          # single full-extent block
    return max(8, (tgt // 8) * 8)         # multiple of 8; partial tail is fine


@functools.partial(jax.jit, static_argnames=("force_stream",))
def residual_forward(x, w1, b1, w2, b2, *, force_stream=False):
    """fn(x + Linear2(fn(Linear1(x)))) with fn = ReLU.

    x : (B, S, D).  w1, w2 : (D, D) stored (in, out) so y = x @ W + b.
    b1, b2 : (1, D).  bf16 weights and/or bf16 x are supported fast paths on
    every TPU generation (v5e's MXU is bf16-native); accumulation, bias,
    residual and ReLU math always stays f32 in-kernel.
    """
    B, S, D = x.shape
    M = B * S
    x2d = x.reshape(M, D)

    x_it = jnp.dtype(x.dtype).itemsize
    w_it = jnp.dtype(w1.dtype).itemsize

    vmem_cap = _vmem_capacity_bytes()
    vmem_usable = int(vmem_cap * 0.75)       # ~48 MiB v7x, ~96 MiB v5e/v6e

    # --- resident weights vs. weight streaming (large D on v7x) --------------
    resident_w_bytes = 2 * D * D * w_it
    stream = (D % 128 == 0) and (force_stream or resident_w_bytes > vmem_cap // 2)
    if stream:
        if force_stream:
            tn = 128
        else:
            tn = 512 if D % 512 == 0 else (256 if D % 256 == 0 else 128)
        n_kblocks = D // tn
        w_vmem = 2 * 2 * D * tn * w_it       # 2 weight blocks, double-buffered
        w_kwargs = {}                        # default pipelining for streamed W
    else:
        tn = D
        n_kblocks = 1
        w_vmem = resident_w_bytes            # resident, single-buffered
        w_kwargs = dict(pipeline_mode=pl.Buffered(1))

    # --- row tile -------------------------------------------------------------
    act_budget = max(4 << 20, vmem_usable - w_vmem - (2 << 20))
    tm = _pick_row_tile(M, D, x_it, act_budget)
    n_mtiles = pl.cdiv(M, tm)
    grid = (n_mtiles, n_kblocks)

    # --- VMEM limit / scheduler cost hint --------------------------------------
    est_vmem = (w_vmem
                + 4 * tm * D * x_it          # x + out tiles, double-buffered
                + 3 * tm * D * 4             # acc scratch + f32 temporaries
                + (2 << 20))
    vmem_limit = int(min(max(int(est_vmem * 1.25), 32 << 20), vmem_usable))

    w_reads = 1 if n_kblocks == 1 else n_mtiles   # streamed weights re-read per M tile
    cost = pl.CostEstimate(
        flops=4 * M * D * D,                      # two (M,D)x(D,D) matmuls
        transcendentals=0,
        bytes_accessed=2 * M * D * x_it + w_reads * 2 * D * D * w_it + 2 * D * 4,
    )

    out2d = pl.pallas_call(
        _residual_kernel,
        out_shape=jax.ShapeDtypeStruct((M, D), x.dtype),
        grid_spec=pltpu.PrefetchScalarGridSpec(
            num_scalar_prefetch=0,
            grid=grid,
            in_specs=[
                pl.BlockSpec((tm, D), lambda i, j: (i, 0)),              # x tile
                pl.BlockSpec((D, tn), lambda i, j: (0, j), **w_kwargs),  # W1 block
                pl.BlockSpec((1, tn), lambda i, j: (0, j), **w_kwargs),  # b1 block
                pl.BlockSpec((tn, D), lambda i, j: (j, 0), **w_kwargs),  # W2 block
                pl.BlockSpec((1, D), lambda i, j: (0, 0),
                             pipeline_mode=pl.Buffered(1)),              # b2
            ],
            out_specs=pl.BlockSpec((tm, D), lambda i, j: (i, 0)),
            scratch_shapes=[pltpu.VMEM((tm, D), jnp.float32)],           # accumulator
        ),
        compiler_params=pltpu.CompilerParams(
            dimension_semantics=("parallel", "arbitrary"),
            vmem_limit_bytes=vmem_limit,
        ),
        cost_estimate=cost,
    )(x2d, w1, b1, w2, b2)

    return out2d.reshape(B, S, D)


def _torch_style_linear_init(key, d):
    """Mimics nn.Linear default init (uniform +/- 1/sqrt(fan_in))."""
    kw, kb = jax.random.split(key)
    bound = 1.0 / jnp.sqrt(d)
    # PyTorch weight is (out, in); we return the transpose (in, out) for x @ W.
    w = jax.random.uniform(kw, (d, d), jnp.float32, -bound, bound)
    b = jax.random.uniform(kb, (1, d), jnp.float32, -bound, bound)
    return w, b


def _reference(x, w1, b1, w2, b2):
    """Pure-JAX reference of Residual.forward with fn=ReLU."""
    p = jnp.maximum(x @ w1 + b1[0], 0.0) @ w2 + b2[0]
    return jnp.maximum(x + p, 0.0)


if __name__ == "__main__":
    key = jax.random.PRNGKey(0)
    k_x, k_l1, k_l2, k_x2, k_x3 = jax.random.split(key, 5)

    # 1) f32, lane-dense D (multiple of 128), resident weights.
    B, S, D = 2, 8, 128
    x = jax.random.normal(k_x, (B, S, D), jnp.float32)
    w1, b1 = _torch_style_linear_init(k_l1, D)
    w2, b2 = _torch_style_linear_init(k_l2, D)
    out = jax.block_until_ready(residual_forward(x, w1, b1, w2, b2))
    ref = _reference(x, w1, b1, w2, b2)
    assert out.shape == (B, S, D)
    assert jnp.allclose(out, ref, atol=1e-4, rtol=1e-4), "mismatch (f32, D=128)"

    # 2) f32, D not a multiple of 128 — masked-lane path, no HBM pad/slice.
    D2 = 32
    x2 = jax.random.normal(k_x2, (B, S, D2), jnp.float32)
    w1s, b1s = _torch_style_linear_init(k_l1, D2)
    w2s, b2s = _torch_style_linear_init(k_l2, D2)
    out2 = jax.block_until_ready(residual_forward(x2, w1s, b1s, w2s, b2s))
    ref2 = _reference(x2, w1s, b1s, w2s, b2s)
    assert out2.shape == (B, S, D2)
    assert jnp.allclose(out2, ref2, atol=1e-4, rtol=1e-4), "mismatch (f32, D=32)"

    # 3) bf16 weights + bf16 activations (fast MXU / half-I/O path).
    xb = x.astype(jnp.bfloat16)
    w1b, w2b = w1.astype(jnp.bfloat16), w2.astype(jnp.bfloat16)
    out3 = jax.block_until_ready(residual_forward(xb, w1b, b1, w2b, b2))
    ref3 = _reference(xb.astype(jnp.float32), w1b.astype(jnp.float32), b1,
                      w2b.astype(jnp.float32), b2)
    assert out3.dtype == jnp.bfloat16
    assert jnp.allclose(out3.astype(jnp.float32), ref3, atol=5e-2, rtol=5e-2), \
        "mismatch (bf16 path)"

    # 4) Weight-streaming path (forced): inner reduction axis with >1 block.
    D4 = 256
    x4 = jax.random.normal(k_x3, (B, S, D4), jnp.float32)
    w14, b14 = _torch_style_linear_init(k_l1, D4)
    w24, b24 = _torch_style_linear_init(k_l2, D4)
    out4 = jax.block_until_ready(
        residual_forward(x4, w14, b14, w24, b24, force_stream=True))
    ref4 = _reference(x4, w14, b14, w24, b24)
    assert jnp.allclose(out4, ref4, atol=1e-4, rtol=1e-4), "mismatch (streamed weights)"

    print("KERNEL_OK")
</pallas_src>

<mosaic_0001>
module attributes {stable_mosaic.version = 11 : i64} {
  func.func @_residual_kernel(%arg0: i32, %arg1: i32, %arg2: memref<8x128xf32, #tpu.memory_space<vmem>>, %arg3: memref<128x128xf32, #tpu.memory_space<vmem>>, %arg4: memref<1x128xf32, #tpu.memory_space<vmem>>, %arg5: memref<128x128xf32, #tpu.memory_space<vmem>>, %arg6: memref<1x128xf32, #tpu.memory_space<vmem>>, %arg7: memref<8x128xf32, #tpu.memory_space<vmem>>, %arg8: memref<8x128xf32, #tpu.memory_space<vmem>>) attributes {dimension_semantics = [#tpu.dimension_semantics<parallel>, #tpu.dimension_semantics<arbitrary>], iteration_bounds = array<i64: 2, 1>, scalar_prefetch = 0 : i64, scratch_operands = 1 : i64, tpu.core_type = #tpu.core_type<tc>, window_params = [{transform_indices = @transform_0, window_bounds = array<i64: 8, 128>}, {pipeline_mode = #tpu.pipeline_mode<synchronous>, transform_indices = @transform_1, window_bounds = array<i64: 128, 128>}, {pipeline_mode = #tpu.pipeline_mode<synchronous>, transform_indices = @transform_2, window_bounds = array<i64: 1, 128>}, {pipeline_mode = #tpu.pipeline_mode<synchronous>, transform_indices = @transform_3, window_bounds = array<i64: 128, 128>}, {pipeline_mode = #tpu.pipeline_mode<synchronous>, transform_indices = @transform_4, window_bounds = array<i64: 1, 128>}, {transform_indices = @transform_5, window_bounds = array<i64: 8, 128>}]} {
    %c0_i32 = arith.constant 0 : i32
    %0 = arith.cmpi eq, %arg1, %c0_i32 : i32
    %1 = arith.extui %0 : i1 to i32
    %c0_i32_0 = arith.constant 0 : i32
    %2 = arith.cmpi ne, %1, %c0_i32_0 : i32
    scf.if %2 {
      %cst_16 = arith.constant 0.000000e+00 : f32
      %19 = vector.broadcast %cst_16 : f32 to vector<8x128xf32>
      %c0_17 = arith.constant 0 : index
      %c0_18 = arith.constant 0 : index
      %20 = vector.load %arg8[%c0_17, %c0_18] : memref<8x128xf32, #tpu.memory_space<vmem>>, vector<8x128xf32>
      tpu.vector_store %arg8[%c0_17, %c0_18], %19 {strides = array<i32>} : memref<8x128xf32, #tpu.memory_space<vmem>>, vector<8x128xf32>,
    } else {
    }
    %c0 = arith.constant 0 : index
    %c0_1 = arith.constant 0 : index
    %3 = vector.load %arg2[%c0, %c0_1] : memref<8x128xf32, #tpu.memory_space<vmem>>, vector<8x128xf32>
    %c0_2 = arith.constant 0 : index
    %c0_3 = arith.constant 0 : index
    %4 = vector.load %arg3[%c0_2, %c0_3] : memref<128x128xf32, #tpu.memory_space<vmem>>, vector<128x128xf32>
    %cst = arith.constant dense<0.000000e+00> : vector<8x128xf32>
    %5 = tpu.matmul %3, %4, %cst {dimension_numbers = #tpu.dot_dimension_numbers<[1], [0], [0], [1], [0, 0, 1, 1], [], []>} : vector<8x128xf32>, vector<128x128xf32>, vector<8x128xf32> -> vector<8x128xf32>
    %c0_4 = arith.constant 0 : index
    %c0_5 = arith.constant 0 : index
    %6 = vector.load %arg4[%c0_4, %c0_5] : memref<1x128xf32, #tpu.memory_space<vmem>>, vector<1x128xf32>
    %7 = vector.broadcast %6 : vector<1x128xf32> to vector<8x128xf32>
    %8 = arith.addf %5, %7 : vector<8x128xf32>
    %cst_6 = arith.constant 0.000000e+00 : f32
    %9 = vector.broadcast %cst_6 : f32 to vector<8x128xf32>
    %10 = arith.maximumf %8, %9 : vector<8x128xf32>
    %c0_7 = arith.constant 0 : index
    %c0_8 = arith.constant 0 : index
    %11 = vector.load %arg8[%c0_7, %c0_8] : memref<8x128xf32, #tpu.memory_space<vmem>>, vector<8x128xf32>
    %c0_9 = arith.constant 0 : index
    %c0_10 = arith.constant 0 : index
    %12 = vector.load %arg5[%c0_9, %c0_10] : memref<128x128xf32, #tpu.memory_space<vmem>>, vector<128x128xf32>
    %cst_11 = arith.constant dense<0.000000e+00> : vector<8x128xf32>
    %13 = tpu.matmul %10, %12, %cst_11 {dimension_numbers = #tpu.dot_dimension_numbers<[1], [0], [0], [1], [0, 0, 1, 1], [], []>} : vector<8x128xf32>, vector<128x128xf32>, vector<8x128xf32> -> vector<8x128xf32>
    %14 = arith.addf %11, %13 : vector<8x128xf32>
    %c0_12 = arith.constant 0 : index
    %c0_13 = arith.constant 0 : index
    %15 = vector.load %arg8[%c0_12, %c0_13] : memref<8x128xf32, #tpu.memory_space<vmem>>, vector<8x128xf32>
    tpu.vector_store %arg8[%c0_12, %c0_13], %14 {strides = array<i32>} : memref<8x128xf32, #tpu.memory_space<vmem>>, vector<8x128xf32>,
    %c0_i32_14 = arith.constant 0 : i32
    %16 = arith.cmpi eq, %arg1, %c0_i32_14 : i32
    %17 = arith.extui %16 : i1 to i32
    %c0_i32_15 = arith.constant 0 : i32
    %18 = arith.cmpi ne, %17, %c0_i32_15 : i32
    scf.if %18 {
      %c0_16 = arith.constant 0 : index
      %c0_17 = arith.constant 0 : index
      %19 = vector.load %arg8[%c0_16, %c0_17] : memref<8x128xf32, #tpu.memory_space<vmem>>, vector<8x128xf32>
      %c0_18 = arith.constant 0 : index
      %c0_19 = arith.constant 0 : index
      %20 = vector.load %arg6[%c0_18, %c0_19] : memref<1x128xf32, #tpu.memory_space<vmem>>, vector<1x128xf32>
      %21 = vector.broadcast %20 : vector<1x128xf32> to vector<8x128xf32>
      %22 = arith.addf %19, %21 : vector<8x128xf32>
      %23 = arith.addf %3, %22 : vector<8x128xf32>
      %cst_20 = arith.constant 0.000000e+00 : f32
      %24 = vector.broadcast %cst_20 : f32 to vector<8x128xf32>
      %25 = arith.maximumf %23, %24 : vector<8x128xf32>
      %c0_21 = arith.constant 0 : index
      %c0_22 = arith.constant 0 : index
      %26 = vector.load %arg7[%c0_21, %c0_22] : memref<8x128xf32, #tpu.memory_space<vmem>>, vector<8x128xf32>
      tpu.vector_store %arg7[%c0_21, %c0_22], %25 {strides = array<i32>} : memref<8x128xf32, #tpu.memory_space<vmem>>, vector<8x128xf32>,
    } else {
    }
    return
  }
  func.func @transform_0(%arg0: i32, %arg1: i32) -> (i32, i32) {
    %c0_i32 = arith.constant 0 : i32
    %c0_i32_0 = arith.constant 0 : i32
    return %arg0, %c0_i32 : i32, i32
  }
  func.func @transform_1(%arg0: i32, %arg1: i32) -> (i32, i32) {
    %c0_i32 = arith.constant 0 : i32
    %c0_i32_0 = arith.constant 0 : i32
    return %c0_i32, %arg1 : i32, i32
  }
  func.func @transform_2(%arg0: i32, %arg1: i32) -> (i32, i32) {
    %c0_i32 = arith.constant 0 : i32
    %c0_i32_0 = arith.constant 0 : i32
    return %c0_i32, %arg1 : i32, i32
  }
  func.func @transform_3(%arg0: i32, %arg1: i32) -> (i32, i32) {
    %c0_i32 = arith.constant 0 : i32
    %c0_i32_0 = arith.constant 0 : i32
    return %arg1, %c0_i32 : i32, i32
  }
  func.func @transform_4(%arg0: i32, %arg1: i32) -> (i32, i32) {
    %c0_i32 = arith.constant 0 : i32
    %c0_i32_0 = arith.constant 0 : i32
    %c0_i32_1 = arith.constant 0 : i32
    return %c0_i32, %c0_i32_0 : i32, i32
  }
  func.func @transform_5(%arg0: i32, %arg1: i32) -> (i32, i32) {
    %c0_i32 = arith.constant 0 : i32
    %c0_i32_0 = arith.constant 0 : i32
    return %arg0, %c0_i32 : i32, i32
  }
}

</mosaic_0001>

<bundles_post_ra>
// kernel: residual_forward.1
= control target key start
LH: loop header
LB: loop body
LE: loop exit
PB: predicated region body
PF: predicated region fallthrough
CT: control target
= control target key end

     0   :  { %10 = vsyncpa [#allocation4], 0  ;;  %s1394_s0 = inlined_call_operand.hbm [shape: f32[16,128], index: 0, kind: input, shape index: {}]   ;;  %s1395_s1 = inlined_call_operand.hbm [shape: f32[128,128], index: 1, kind: input, shape index: {}]   ;;  %s1396_s2 = inlined_call_operand.vmem [shape: f32[1,128], index: 2, kind: input, shape index: {}]   ;;  %s1397_s3 = inlined_call_operand.hbm [shape: f32[128,128], index: 3, kind: input, shape index: {}]   ;;  %s1398_s4 = inlined_call_operand.vmem [shape: f32[1,128], index: 4, kind: input, shape index: {}]   ;;  %s1399_s5 = inlined_call_operand.hbm [shape: f32[16,128], index: 5, kind: output, shape index: {}]  }
   0x1   :  { %12 = vsyncpa [#allocation4 + $0x1], 0 }
   0x2   :  { %13 = vsyncpa [#allocation7], 0 }
   0x3   :  { %14 = vsyncpa [#allocation5], 0 }
   0x4   :  { %16 = vsyncpa [#allocation5 + $0x1], 0  ;;  %s1115_s18 = smov 0   ;;  %s1117_s19 = smov 0  }
   0x5   :  { %s1119_s20 = smov 0   ;;  %s1121_s21 = smov 0  }
   0x6   :  { %s1123_s22 = smov 0   ;;  %s1125_s23 = smov 0  }
   0x7 LB: > { %s642_s24 = sadd.s32 4294967295, %s1074_s23   ;;  %s643_s25 = sadd.s32 4294967294, %s1074_s23   ;;  %s1074_s23 = sphi %s1125_s23, %s22_s23   ;;  %s1070_s22 = sphi %s1123_s22, %s1421_s22   ;;  %s1066_s21 = sphi %s1121_s21, %s1420_s21   ;;  %s1062_s20 = sphi %s1119_s20, %s1419_s20   ;;  %s1058_s19 = sphi %s1117_s19, %s1418_s19   ;;  %s1054_s18 = sphi %s1115_s18, %s1417_s18  }
   0x8   : > { %p54_p0 = scmp.ne.s32.totalorder %s1058_s19, %s1054_s18  ;;  %p1149_p1 = scmp.eq.s32.totalorder %s642_s24, 0 }
   0x9   : > { %p1153_p2 = scmp.eq.s32.totalorder %s642_s24, 1  ;;  %p183_p3 = scmp.eq.s32.totalorder %s643_s25, 1 }
   0xa   : > { %s1404_s26 = scalar_select %p1149_p1, 1, 0 }
   0xb   : > { %p1159_p4 = por %p1149_p1, %p54_p0  ;;  %p644_p5 = scmp.ge.s32.totalorder %s1074_s23, 1 }
   0xc   : > { %p1164_p6 = por %p183_p3, %p54_p0  ;;  %p190_p7 = scmp.lt.s32.totalorder %s1074_s23, 3 }
   0xd   : > { %s1406_s28 = scalar_select %p1159_p4, 1, 0 }
   0xe   : > { %s1407_s29 = scalar_select %p1164_p6, 1, 0 }
   0xf   : > { %p1169_p8 = pnand %p644_p5, %p190_p7  ;;  %s1076_s6 = smov [#allocation6]  }
  0x10   : > { %s204_s7 = sshll.u32 %s1076_s6, 4  ;;  %s1077_s9 = smov [#allocation8]   ;;  %s1173_s7 = int_to_ptr.vmem [resolvable:$true] %s204_s7 }
  0x11   : > { %p826_p9 = pneg %p1169_p8  ;;  %s226_s10 = sshll.u32 %s1077_s9, 4  ;;  %s1184_s10 = int_to_ptr.vmem [resolvable:$true] %s226_s10 }
  0x12   : > { %s902_s13 = scalar_lea.hbm %s1395_s1, 2048 }
  0x13   : > { %p1180_p11 = pnand %p826_p9, %p1149_p1  ;;  %p903_p12 = scmp.ne.s32.totalorder %s1395_s1, %s902_s13 }
  0x14   : > { %p909_p5 = scmp.lt.u32.totalorder %s902_s13, %s1395_s1 }
  0x15   : > { %p904_p13 = pneg %p1180_p11 }
  0x17   : > { %p905_p0 = pnand %p904_p13, %p903_p12 }
  0x19   : > { %p906_p3 = pneg %p905_p0 }
  0x1b   : > { %p911_p7 = pnand %p909_p5, %p906_p3 }
  0x1d   : > { %914 = shalt.err (!%p911_p7)
}
  0x1e   : > { %s915_s24 = scalar_lea.vmem %s1173_s7, 2048  ;;  %p923_p1 = scmp.lt.s32.totalorder %s1173_s7, %s1173_s7 }
  0x1f   : > { %p916_p9 = scmp.ne.s32.totalorder %s1173_s7, %s915_s24  ;;  %p924_p12 = scmp.lt.s32.totalorder %s915_s24, %s915_s24 }
  0x21   : > { %p918_p10 = pnand %p916_p9, %p904_p13  ;;  %p925_p0 = por %p924_p12, %p923_p1 }
  0x23   : > { %p919_p6 = pneg %p918_p10 }
  0x25   : > { %p926_p4 = pnand %p925_p0, %p919_p6 }
  0x27   : > { %929 = shalt.err (!%p926_p4)
}
  0x28   : > { %s1078_s25 = smov 128   ;;  %s1079_s6 = smov 8  }
  0x29   : > { %829 = dma.hbm_to_vmem [thread:$0]  (!%p1180_p11), %s1395_s1, 2048, %s1173_s7, [#allocation7], %s1078_s25, %s1078_s25, %s1079_s6  }
  0x2a   : > { %s930_s14 = scalar_lea.hbm %s1397_s3, 2048 }
  0x2b   : > { %p931_p1 = scmp.ne.s32.totalorder %s1397_s3, %s930_s14  ;;  %p937_p10 = scmp.lt.u32.totalorder %s930_s14, %s1397_s3 }
  0x2d   : > { %p933_p4 = pnand %p931_p1, %p904_p13 }
  0x2f   : > { %p934_p6 = pneg %p933_p4 }
  0x31   : > { %p939_p3 = pnand %p937_p10, %p934_p6 }
  0x33   : > { %942 = shalt.err (!%p939_p3)
}
  0x34   : > { %s943_s7 = scalar_lea.vmem %s1184_s10, 2048  ;;  %p951_p12 = scmp.lt.s32.totalorder %s1184_s10, %s1184_s10 }
  0x35   : > { %p944_p5 = scmp.ne.s32.totalorder %s1184_s10, %s943_s7  ;;  %p952_p0 = scmp.lt.s32.totalorder %s943_s7, %s943_s7 }
  0x37   : > { %p946_p7 = pnand %p944_p5, %p904_p13  ;;  %p953_p1 = por %p952_p0, %p951_p12 }
  0x39   : > { %p947_p9 = pneg %p946_p7 }
  0x3b   : > { %p954_p4 = pnand %p953_p1, %p947_p9 }
  0x3d   : > { %957 = shalt.err (!%p954_p4)
}
  0x3e   : > { %832 = dma.hbm_to_vmem [thread:$0]  (!%p1180_p11), %s1397_s3, 2048, %s1184_s10, [#allocation7], %s1078_s25, %s1078_s25, %s1079_s6  }
  0x3f   : > { %s34_s12 = sadd.s32 1, %s1070_s22  ;;  %s41_s13 = sadd.s32 1, %s1062_s20 }
  0x40   : > { %p36_p13 = scmp.ge.s32.totalorder %s34_s12, 2  ;;  %p48_p6 = scmp.ne.s32.totalorder %s1062_s20, %s1058_s19 }
  0x41   : > { %p49_p10 = scmp.eq.s32.totalorder %s1074_s23, 0  ;;  %p843_p3 = scmp.lt.s32.totalorder %s1074_s23, 2 }
  0x42   : > { %s1423_s12 = smov (%p36_p13, %s34_s12), 0  ;;  %p1248_p7 = por %p1153_p2, %p48_p6 }
  0x43   : > { %p50_p5 = por %p49_p10, %p48_p6  ;;  %s38_s14 = ssub.s32 %s1070_s22, %s1423_s12 }
  0x44   : > { %s1410_s8 = scalar_select %p1248_p7, 1, 0 }
  0x45   : > { %s243_s15 = sand.u32 1, %s1062_s20   ;;  %p39_p9 = scmp.eq.s32.totalorder %s38_s14, 0 }
  0x46   : > { %s649_s10 = sshll.u32 %s243_s15, 3  ;;  %s650_s25 = sshll.u32 %s1070_s22, 7 }
  0x47   : > { %s1257_s6 = scalar_select %p39_p9, %s1062_s20, %s41_s13  }
  0x48   : > { %s1262_s24 = scalar_lea.hbm %s1394_s0, %s650_s25  ;;  %s247_s27 = scalar_lea.vmem [#allocation3], %s649_s10 }
  0x49   : > { %s254_s7 = sshll.u32 %s247_s27, 4  ;;  %p1266_p2 = pnand %p843_p3, %p50_p5  ;;  %s1270_s7 = int_to_ptr.vmem [resolvable:$true] %s254_s7 }
  0x4a   : > { %s244_s11 = scalar_lea.sflag [#allocation4], %s243_s15  ;;  %s958_s13 = scalar_lea.hbm %s1262_s24, 128 }
  0x4b   : > { %p959_p11 = scmp.ne.s32.totalorder %s1262_s24, %s958_s13  ;;  %p960_p12 = pneg %p1266_p2 }
  0x4c   : > { %s963_s25 = scalar_lea.hbm %s1394_s0, 256  ;;  %p964_p4 = scmp.lt.u32.totalorder %s1262_s24, %s1394_s0 }
  0x4d   : > { %p961_p0 = pnand %p960_p12, %p959_p11  ;;  %p965_p13 = scmp.lt.u32.totalorder %s963_s25, %s958_s13 }
  0x4e   : > { %p967_p10 = scmp.lt.u32.totalorder %s958_s13, %s1262_s24 }
  0x4f   : > { %p962_p1 = pneg %p961_p0  ;;  %p966_p6 = por %p965_p13, %p964_p4 }
  0x51   : > { %p968_p3 = por %p967_p10, %p966_p6 }
  0x53   : > { %p969_p5 = pnand %p968_p3, %p962_p1 }
  0x55   : > { %972 = shalt.err (!%p969_p5)
}
  0x56   : > { %s973_s15 = scalar_lea.vmem %s1270_s7, 128  ;;  %s1080_s27 = smov [#allocation3]  }
  0x57   : > { %p974_p9 = scmp.ne.s32.totalorder %s1270_s7, %s973_s15  ;;  %s978_s14 = sshll.u32 %s1080_s27, 4  ;;  %s979_s14 = int_to_ptr.vmem [resolvable:$false] %s978_s14 }
  0x58   : > { %s980_s10 = scalar_lea.vmem %s979_s14, 256  ;;  %p981_p7 = scmp.lt.s32.totalorder %s1270_s7, %s979_s14 }
  0x59   : > { %p976_p11 = pnand %p974_p9, %p960_p12  ;;  %p982_p4 = scmp.lt.s32.totalorder %s980_s10, %s973_s15 }
  0x5b   : > { %p977_p0 = pneg %p976_p11  ;;  %p983_p13 = por %p982_p4, %p981_p7 }
  0x5d   : > { %p984_p6 = pnand %p983_p13, %p977_p0 }
  0x5f   : > { %987 = shalt.err (!%p984_p6)
}
  0x60   : > { %836 = dma.hbm_to_vmem [thread:$0]  (!%p1266_p2), %s1262_s24, 128, %s1270_s7, %s244_s11  }
  0x61   : > { %263 = sbr.rel (%p1169_p8) target bundleno = 591 (0x24f), region = 40  ;;  %s1300_s13 = sand.u32 (!%p1169_p8), 1, %s1058_s19  }
  0x62   : > { %s652_s25 = sshll.u32 (!%p1169_p8), %s1300_s13, 3  ;;  %s266_s16 = scalar_lea.sflag (!%p1169_p8), [#allocation4], %s1300_s13 }
  0x63   : > { %s1306_s17 = scalar_lea.vmem (!%p1169_p8), [#allocation3], %s652_s25  ;;  %p1412_p7 = scmp.ne.s32.totalorder (!%p1169_p8), %s1406_s28, 0 }
  0x68   : > { %1041 = dma.done.wait (%p1412_p7), %s266_s16, 128  }
  0x69   : > { %1043 = vsyncadd (%p1412_p7), %s266_s16, 4294967168  ;;  %p1413_p2 = scmp.ne.s32.totalorder %s1404_s26, 0 }
  0x6b   : > { %1045 = dma.done.wait (%p1413_p2), [#allocation7], 4096  }
  0x6c   : > { %1047 = vsyncadd (%p1413_p2), [#allocation7], 4294963200  ;;  %v1081_v0 = vmov 0.0|0.0   ;;  %vm1082_vm0 = vmmov 0   ;;  %v1083_v1 = vmov 0.0   ;;  %v317_v2 = vld [vmem:[#allocation6] sm:$0xff] }
  0x6d   : > { %766 = vmatprep.subr.bf16.mxu0 %v1081_v0  ;;  %728 = vmatprep.mubr.msk.f32.mxu0 %vm1082_vm0, %v1083_v1  ;;  %v318_v3 = vld [vmem:[#allocation6 + $0x8] sm:$0xff]  ;;  %v319_v4 = vld [vmem:[#allocation6 + $0x10] sm:$0xff]  ;;  %v320_v6 = vld [vmem:[#allocation6 + $0x18] sm:$0xff]  ;;  %s659_s7 = sshll.u32 %s1066_s21, 7  ;;  %s306_s9 = scalar_lea.vmem [#allocation9], %s652_s25 }
  0x6e   : > { %790 = vmatprep.subr.bf16.mxu1 %v1081_v0  ;;  %763 = vmatprep.mubr.msk.f32.mxu1 %vm1082_vm0, %v1083_v1  ;;  %v767_v5 = vpack.c.bf16 %v318_v3, %v317_v2  ;;  %v770_v7 = vpack.c.bf16 %v320_v6, %v319_v4  ;;  %v321_v8 = vld [vmem:[#allocation6 + $0x20] sm:$0xff]  ;;  %v322_v9 = vld [vmem:[#allocation6 + $0x28] sm:$0xff]  ;;  %v414_v12 = vld [vmem:[#allocation8 + $0x10] sm:$0xff]  ;;  %s529_s11 = sshll.u32 %s306_s9, 4  ;;  %s1345_s14 = scalar_lea.hbm %s1399_s5, %s659_s7  ;;  %s1347_s11 = int_to_ptr.vmem [resolvable:$true] %s529_s11 }
  0x6f   : > { %v412_v10 = vld [vmem:[#allocation8] sm:$0xff]  ;;  %v413_v11 = vld [vmem:[#allocation8 + $0x8] sm:$0xff]  ;;  %v415_v13 = vld [vmem:[#allocation8 + $0x18] sm:$0xff]  ;;  %v773_v14 = vpack.c.bf16 %v322_v9, %v321_v8  ;;  %s516_s10 = scalar_lea.sflag [#allocation5], %s1300_s13  ;;  %s988_s16 = scalar_lea.vmem %s1347_s11, 128 }
  0x70   : > { %768 = vmatpush3.bf16.msra.mxu0 %v767_v5  ;;  %v791_v15 = vpack.c.bf16 %v413_v11, %v412_v10  ;;  %v323_v16 = vld [vmem:[#allocation6 + $0x30] sm:$0xff]  ;;  %v324_v17 = vld [vmem:[#allocation6 + $0x38] sm:$0xff]  ;;  %v794_v18 = vpack.c.bf16 %v415_v13, %v414_v12  ;;  %v416_v19 = vld [vmem:[#allocation8 + $0x20] sm:$0xff]  ;;  %p989_p8 = scmp.ne.s32.totalorder %s1347_s11, %s988_s16  ;;  %p1414_p12 = scmp.ne.s32.totalorder %s1410_s8, 0 }
  0x71   : > { %769 = vmatprep.subr.bf16.mxu0 %v1081_v0  ;;  %v417_v20 = vld [vmem:[#allocation8 + $0x28] sm:$0xff]  ;;  %v776_v21 = vpack.c.bf16 %v324_v17, %v323_v16  ;;  %v325_v22 = vld [vmem:[#allocation6 + $0x40] sm:$0xff]  ;;  %v418_v25 = vld [vmem:[#allocation8 + $0x30] sm:$0xff]  ;;  %s1084_s21 = smov [#allocation9]  }
  0x72   : > { %792 = vmatpush3.bf16.msra.mxu1 %v791_v15  ;;  %v326_v23 = vld [vmem:[#allocation6 + $0x48] sm:$0xff]  ;;  %v797_v24 = vpack.c.bf16 %v417_v20, %v416_v19  ;;  %v419_v26 = vld [vmem:[#allocation8 + $0x38] sm:$0xff]  ;;  %v327_v28 = vld [vmem:[#allocation6 + $0x50] sm:$0xff]  ;;  %p990_p1 = pnand %p989_p8, %p1414_p12  ;;  %s992_s25 = sshll.u32 %s1084_s21, 4  ;;  %s993_s25 = int_to_ptr.vmem [resolvable:$false] %s992_s25 }
  0x73   : > { %793 = vmatprep.subr.bf16.mxu1 %v1081_v0  ;;  %v779_v27 = vpack.c.bf16 %v326_v23, %v325_v22  ;;  %v328_v29 = vld [vmem:[#allocation6 + $0x58] sm:$0xff]  ;;  %v800_v30 = vpack.c.bf16 %v419_v26, %v418_v25  ;;  %v420_v31 = vld [vmem:[#allocation8 + $0x40] sm:$0xff]  ;;  %v421_v32 = vld [vmem:[#allocation8 + $0x48] sm:$0xff]  ;;  %p995_p3 = scmp.lt.s32.totalorder %s1347_s11, %s993_s25 }
  0x74   : > { %771 = vmatpush3.bf16.msra.mxu0 %v770_v7  ;;  %v782_v33 = vpack.c.bf16 %v328_v29, %v327_v28  ;;  %v329_v34 = vld [vmem:[#allocation6 + $0x60] sm:$0xff]  ;;  %v330_v35 = vld [vmem:[#allocation6 + $0x68] sm:$0xff]  ;;  %v803_v36 = vpack.c.bf16 %v421_v32, %v420_v31  ;;  %v422_v37 = vld [vmem:[#allocation8 + $0x50] sm:$0xff]  ;;  %p991_p10 = pneg %p990_p1 }
  0x75   : > { %772 = vmatprep.subr.bf16.mxu0 %v1081_v0  ;;  %v423_v38 = vld [vmem:[#allocation8 + $0x58] sm:$0xff]  ;;  %v785_v39 = vpack.c.bf16 %v330_v35, %v329_v34  ;;  %v331_v40 = vld [vmem:[#allocation6 + $0x70] sm:$0xff]  ;;  %v424_v43 = vld [vmem:[#allocation8 + $0x60] sm:$0xff] }
  0x76   : > { %795 = vmatpush3.bf16.msra.mxu1 %v794_v18  ;;  %v332_v41 = vld [vmem:[#allocation6 + $0x78] sm:$0xff]  ;;  %v806_v42 = vpack.c.bf16 %v423_v38, %v422_v37  ;;  %v425_v44 = vld [vmem:[#allocation8 + $0x68] sm:$0xff]  ;;  %v426_v48 = vld [vmem:[#allocation8 + $0x70] sm:$0xff] }
  0x77   : > { %796 = vmatprep.subr.bf16.mxu1 %v1081_v0  ;;  %v788_v45 = vpack.c.bf16 %v332_v41, %v331_v40  ;;  %v809_v46 = vpack.c.bf16 %v425_v44, %v424_v43  ;;  %v316_v47 = vld [vmem:[%s1306_s17] sm:$0xff]  ;;  %s994_s17 = scalar_lea.vmem %s993_s25, 256 }
  0x78   : > { %774 = vmatpush3.bf16.msra.mxu0 %v773_v14  ;;  %v427_v49 = vld [vmem:[#allocation8 + $0x78] sm:$0xff]  ;;  %v656_v51 = vld [vmem:[%s1396_s2] ss:$0 sm:$0xff]  ;;  %p996_p5 = scmp.lt.s32.totalorder %s994_s17, %s988_s16 }
  0x79   : > { %775 = vmatprep.subr.bf16.mxu0 %v1081_v0  ;;  %v812_v50 = vpack.c.bf16 %v427_v49, %v426_v48  ;;  %v657_v56 = vld [vmem:[%s1398_s4] ss:$0 sm:$0xff] }
  0x7a   : > { %798 = vmatpush3.bf16.msra.mxu1 %v797_v24  ;;  %p997_p9 = por %p996_p5, %p995_p3 }
  0x7b   : > { %799 = vmatprep.subr.bf16.mxu1 %v1081_v0 }
  0x7c   : > { %777 = vmatpush3.bf16.msra.mxu0 %v776_v21  ;;  %p998_p11 = pnand %p997_p9, %p991_p10 }
  0x7d   : > { %778 = vmatprep.subr.bf16.mxu0 %v1081_v0 }
  0x7e   : > { %801 = vmatpush3.bf16.msra.mxu1 %v800_v30 }
  0x7f   : > { %802 = vmatprep.subr.bf16.mxu1 %v1081_v0 }
  0x80   : > { %780 = vmatpush3.bf16.msra.mxu0 %v779_v27 }
  0x81   : > { %781 = vmatprep.subr.bf16.mxu0 %v1081_v0 }
  0x82   : > { %804 = vmatpush3.bf16.msra.mxu1 %v803_v36 }
  0x83   : > { %805 = vmatprep.subr.bf16.mxu1 %v1081_v0 }
  0x84   : > { %783 = vmatpush3.bf16.msra.mxu0 %v782_v33 }
  0x85   : > { %784 = vmatprep.subr.bf16.mxu0 %v1081_v0 }
  0x86   : > { %807 = vmatpush3.bf16.msra.mxu1 %v806_v42 }
  0x87   : > { %808 = vmatprep.subr.bf16.mxu1 %v1081_v0 }
  0x88   : > { %786 = vmatpush3.bf16.msra.mxu0 %v785_v39 }
  0x89   : > { %787 = vmatprep.subr.bf16.mxu0 %v1081_v0 }
  0x8a   : > { %810 = vmatpush3.bf16.msra.mxu1 %v809_v46 }
  0x8b   : > { %811 = vmatprep.subr.bf16.mxu1 %v1081_v0 }
  0x8c   : > { %789 = vmatpush3.bf16.msra.mxu0 %v788_v45 }
  0x8e   : > { %813 = vmatpush3.bf16.msra.mxu1 %v812_v50 }
  0x8f   : > { %729 = vmatmul.mubr.f32.vlgmr.msra.gmra.mrb[0].mxu0 %v316_v47 }
 0x162   : > { %v406_v52 = vpop.f32.mrb[0].mxu0 }
 0x163   : > { %v407_v53 = vadd.f32 %v656_v51, %v406_v52  ;;  %v730_v54 = vpop.f32.mrb[1].mxu0 }
 0x165   : > { %v410_v55 = vmax.f32 %v407_v53, 0.0 }
 0x167   : > { %764 = vmatmul.mubr.f32.vlgmr.msra.gmra.mrb[0].mxu1 %v410_v55 }
 0x23a   : > { %v494_v57 = vpop.f32.mrb[0].mxu1 }
 0x23b   : > { %v511_v58 = vadd.f32 %v657_v56, %v494_v57  ;;  %v765_v59 = vpop.f32.mrb[1].mxu1 }
 0x23d   : > { %v512_v60 = vadd.f32 %v511_v58, %v316_v47 }
 0x23f   : > { %v513_v61 = vmax.f32 %v512_v60, 0.0 }
 0x241   : > { %514 = vst [vmem:[%s306_s9] sm:$0xff] %v513_v61 }
 0x242   : > { %1001 = shalt.err (!%p998_p11)
}
 0x243   : > { %s1002_s13 = scalar_lea.hbm %s1345_s14, 128  ;;  %s1006_s30 = scalar_lea.hbm %s1399_s5, 256 }
 0x244   : > { %p1003_p0 = scmp.ne.s32.totalorder %s1345_s14, %s1002_s13  ;;  %p1007_p6 = scmp.lt.u32.totalorder %s1345_s14, %s1399_s5 }
 0x245   : > { %p1008_p7 = scmp.lt.u32.totalorder %s1006_s30, %s1002_s13  ;;  %p1010_p8 = scmp.lt.u32.totalorder %s1002_s13, %s1345_s14 }
 0x246   : > { %p1004_p4 = pnand %p1003_p0, %p1414_p12 }
 0x247   : > { %p1009_p2 = por %p1008_p7, %p1007_p6 }
 0x248   : > { %p1005_p13 = pneg %p1004_p4 }
 0x249   : > { %p1011_p1 = por %p1010_p8, %p1009_p2 }
 0x24b   : > { %p1012_p10 = pnand %p1011_p1, %p1005_p13 }
 0x24d   : > { %1015 = shalt.err (!%p1012_p10)
}
 0x24e   : > { %824 = dma.vmem_to_hbm [thread:$0]  (%p1414_p12), %s1347_s11, 128, %s1345_s14, %s516_s10  }
 0x24f PF: > { %s541_s9 = sand.u32 1, %s1054_s18   ;;  %p1415_p3 = scmp.ne.s32.totalorder %s1407_s29, 0 }
 0x250   : > { %p1416_p5 = scmp.ge.s32.totalorder %s1074_s23, 2  ;;  %s542_s15 = scalar_lea.sflag [#allocation5], %s541_s9 }
 0x252   : > { %p838_p9 = pnand %p1416_p5, %p1415_p3 }
 0x254   : > { %1049 = dma.done.wait (!%p838_p9), %s542_s15, 128  }
 0x255   : > { %1051 = vsyncadd (!%p838_p9), %s542_s15, 4294967168  ;;  %s22_s23 = sadd.s32 1, %s1074_s23   ;;  %s1417_s18 = smov %s1058_s19 }
 0x256   : > { %p19_p11 = scmp.ge.s32.totalorder %s22_s23, 4   ;;  %s1418_s19 = smov %s1062_s20 }
 0x257   : > { %s1419_s20 = smov %s1257_s6  ;;  %s1420_s21 = smov %s1070_s22 }
 0x258   : > { %s1421_s22 = smov %s1423_s12  ;;  %21 = sbr.rel (!%p19_p11) target bundleno = 7 (0x7), region = 106 }
 0x25f   :  { %547 = vsyncpa [#allocation4], 1 }
 0x260   :  { %549 = vsyncpa [#allocation4 + $0x1], 1 }
 0x261   :  { %550 = vsyncpa [#allocation7], 1 }
 0x262   :  { %551 = vsyncpa [#allocation5], 1 }
 0x263   :  { %553 = vsyncpa [#allocation5 + $0x1], 1 }

</bundles_post_ra>
